<compile_context>
chip_gen: v5e
topology: v5e:2x2
jax: 0.10.0
libtpu: 0.0.40
codegen_flags: <defaults>
</compile_context>

<pallas_src>
import jax
import jax.numpy as jnp
import numpy as np
from jax.experimental import pallas as pl
from jax.experimental.pallas import tpu as pltpu

GAMMA = 5.0  # self.gamma


def _fuse_kernel(pred_ref, w4r_ref, b4_ref, wtt_ref, out_ref):
    """Single grid step processes the whole batch.

    pred_ref : (B, N, C)   logits (native dtype, upcast here)
    w4r_ref  : (N, C, 2P)  attn4.weight rearranged (see module docstring)
    b4_ref   : (1, 2P)     attn4.bias
    wtt_ref  : (A, 2P)     self.weight transposed  (A == N)
    out_ref  : (B, C)      fused output per sample
    """
    pred = pred_ref[...].astype(jnp.float32)                       # (B, N, C)

    # pred_soft = softmax(pred, dim=1 of each (N, C) sample) -> over classes.
    # Exact division (no approx reciprocal: its error is amplified by
    # exp(-gamma * x) below).
    m = jnp.max(pred, axis=2, keepdims=True)
    e = jnp.exp(pred - m)
    pred_soft = e / jnp.sum(e, axis=2, keepdims=True)               # (B, N, C)

    # pred_shift = exp(-gamma * (pred_soft - mean(pred_soft, dim=0)))
    # (mean over the N rows of each sample; sublane reduce on the XLU)
    pred_shift = jnp.exp(
        -GAMMA * (pred_soft - jnp.mean(pred_soft, axis=1, keepdims=True)))

    # y4 = attn4(flatten(pred_shift)):
    #   y4[b, k] = b4[k] + sum_{n,c} pred_shift[b, n, c] * w4r[n, c, k]
    # VPU broadcast-multiply + two reductions (no MXU, no in-kernel flatten).
    t = pred_shift[:, :, :, None] * w4r_ref[...]                    # (B, N, C, 2P)
    y4 = jnp.sum(jnp.sum(t, axis=1), axis=1) + b4_ref[...]          # (B, 2P)

    # scores = y4 @ self.weight; weight pre-transposed to (A, 2P) so the
    # contraction is a lane (last-axis) XLU reduce -- no MXU, no transpose.
    scores = jnp.sum(y4[:, None, :] * wtt_ref[...], axis=2)         # (B, A)

    # alpha = softmax(scores, dim=0): per sample that axis has size 1, so
    # max == scores and the denominator is the single numerator.  Collapsed
    # but exact form (alpha == 1.0 for finite scores, NaN/Inf still propagate
    # exactly like the PyTorch module).
    a = jnp.exp(scores - scores)
    alpha = a / a                                                   # (B, A), A == N

    # out[b, c] = sum_n alpha[b, n] * pred[b, n, c]   (VPU mul + sublane reduce)
    out = jnp.sum(pred * alpha[:, :, None], axis=1)                 # (B, C)
    out_ref[...] = out.astype(out_ref.dtype)


def prepare_params(params, atten_size, num_classes):
    """One-time weight glue; nothing layout-related runs per forward call."""
    N, C = atten_size, num_classes
    P = N * C
    w4 = jnp.asarray(params["attn4_w"], jnp.float32)                # (2P, P)
    b4 = jnp.asarray(params["attn4_b"], jnp.float32)                # (2P,)
    wt = jnp.asarray(params["weight"], jnp.float32)                 # (2P, A)
    # w4r[n, c, k] = w4[k, n*C + c]  -> contraction over (n, c) inside kernel.
    w4r = jnp.transpose(w4.reshape(2 * P, N, C), (1, 2, 0))         # (N, C, 2P)
    wtt = wt.T                                                      # (A, 2P)
    return {"w4r": w4r, "b4": b4.reshape(1, 2 * P), "wtt": wtt}


@jax.jit
def attention_fuse_forward_batched(kparams, pred):
    """pred: (B, N, C) -> (B, C).  Whole batch in ONE grid step (launch-bound op)."""
    B, N, C = pred.shape
    P2 = kparams["b4"].shape[1]                                     # 2 * P
    A = kparams["wtt"].shape[0]                                     # atten_size == N

    return pl.pallas_call(
        _fuse_kernel,
        out_shape=jax.ShapeDtypeStruct((B, C), jnp.float32),
        grid=(1,),
        in_specs=[
            pl.BlockSpec((B, N, C), lambda i: (0, 0, 0)),
            pl.BlockSpec((N, C, P2), lambda i: (0, 0, 0)),
            pl.BlockSpec((1, P2), lambda i: (0, 0)),
            pl.BlockSpec((A, P2), lambda i: (0, 0)),
        ],
        out_specs=pl.BlockSpec((B, C), lambda i: (0, 0)),
        compiler_params=pltpu.CompilerParams(
            dimension_semantics=("arbitrary",)),
    )(pred, kparams["w4r"], kparams["b4"], kparams["wtt"])


def attention_fuse_forward(kparams, pred, x_path=None, x_emb=None, x_feat=None):
    # x_path / x_emb / x_feat (and attn1/attn2/attn3) are never used by the
    # module's forward; accepted for signature parity and ignored (dead inputs).
    return attention_fuse_forward_batched(kparams, pred[None])[0]


def reference_forward(params, pred):
    """Pure-JAX reference, line-for-line the PyTorch module forward."""
    pred = pred.astype(jnp.float32)
    pred_soft = jax.nn.softmax(pred, axis=1)
    pred_shift = jnp.exp(-GAMMA * (pred_soft - jnp.mean(pred_soft, axis=0)))
    y4 = pred_shift.reshape(1, -1) @ params["attn4_w"].T + params["attn4_b"]
    alpha = jax.nn.softmax(y4 @ params["weight"], axis=0).reshape(-1, 1)
    return jnp.sum(pred * alpha, axis=0).reshape(-1)


if __name__ == "__main__":
    # Module config (small, consistent with the forward pass):
    input_size_path = input_size_emb = input_feat_emb = 16
    hidden_size = 32
    atten_size = 8                       # N (== A: alpha broadcasts over pred rows)
    num_classes = 4                      # C
    input_pred_emb = atten_size * num_classes   # P = flatten(pred) size = 32
    batch = 2                            # whole batch handled in one grid step

    key = jax.random.PRNGKey(0)
    ks = jax.random.split(key, 8)
    P = input_pred_emb

    # attn4: Linear(P, 2P)
    lim4 = 1.0 / np.sqrt(P)
    attn4_w = jax.random.uniform(ks[0], (2 * P, P), jnp.float32, -lim4, lim4)
    attn4_b = jax.random.uniform(ks[1], (2 * P,), jnp.float32, -lim4, lim4)
    # self.weight: (2P, atten_size), xavier-uniform
    limw = np.sqrt(6.0 / (2 * P + atten_size))
    weight = jax.random.uniform(ks[2], (2 * P, atten_size), jnp.float32, -limw, limw)
    params = {"attn4_w": attn4_w, "attn4_b": attn4_b, "weight": weight}
    # attn1 / attn2 / attn3 exist in __init__ but are never used by forward().

    # One-time parameter preparation (layout + casts hoisted out of hot path).
    kparams = prepare_params(params, atten_size, num_classes)

    pred = jax.random.normal(ks[3], (batch, atten_size, num_classes), jnp.float32)
    x_path = jax.random.normal(ks[4], (batch, atten_size, input_size_path), jnp.float32)
    x_emb = jax.random.normal(ks[5], (batch, atten_size, input_size_emb), jnp.float32)
    x_feat = jax.random.normal(ks[6], (batch, atten_size, input_feat_emb), jnp.float32)

    # Batched kernel call: one pallas_call, one grid step, whole batch.
    out = attention_fuse_forward_batched(kparams, pred)
    out = jax.block_until_ready(out)

    ref = jnp.stack([reference_forward(params, pred[b]) for b in range(batch)])
    np.testing.assert_allclose(np.asarray(out), np.asarray(ref), rtol=1e-5, atol=1e-5)

    # Module-faithful single-sample API (x_* accepted, unused).
    out0 = attention_fuse_forward(kparams, pred[0], x_path[0], x_emb[0], x_feat[0])
    out0 = jax.block_until_ready(out0)
    np.testing.assert_allclose(np.asarray(out0), np.asarray(ref[0]),
                               rtol=1e-5, atol=1e-5)

    print("KERNEL_OK")
</pallas_src>

<mosaic_0001>
module attributes {stable_mosaic.version = 11 : i64} {
  func.func @_fuse_kernel(%arg0: i32, %arg1: memref<2x8x4xf32, #tpu.memory_space<vmem>>, %arg2: memref<8x4x64xf32, #tpu.memory_space<vmem>>, %arg3: memref<1x64xf32, #tpu.memory_space<vmem>>, %arg4: memref<8x64xf32, #tpu.memory_space<vmem>>, %arg5: memref<2x4xf32, #tpu.memory_space<vmem>>) attributes {dimension_semantics = [#tpu.dimension_semantics<arbitrary>], iteration_bounds = array<i64: 1>, scalar_prefetch = 0 : i64, scratch_operands = 0 : i64, tpu.core_type = #tpu.core_type<tc>, window_params = [{pipeline_mode = #tpu.pipeline_mode<synchronous>, transform_indices = @transform_0, window_bounds = array<i64: 2, 8, 4>}, {pipeline_mode = #tpu.pipeline_mode<synchronous>, transform_indices = @transform_1, window_bounds = array<i64: 8, 4, 64>}, {pipeline_mode = #tpu.pipeline_mode<synchronous>, transform_indices = @transform_2, window_bounds = array<i64: 1, 64>}, {pipeline_mode = #tpu.pipeline_mode<synchronous>, transform_indices = @transform_3, window_bounds = array<i64: 8, 64>}, {pipeline_mode = #tpu.pipeline_mode<synchronous>, transform_indices = @transform_4, window_bounds = array<i64: 2, 4>}]} {
    %c0 = arith.constant 0 : index
    %c0_0 = arith.constant 0 : index
    %c0_1 = arith.constant 0 : index
    %0 = vector.load %arg1[%c0, %c0_0, %c0_1] : memref<2x8x4xf32, #tpu.memory_space<vmem>>, vector<2x8x4xf32>
    %cst = arith.constant dense<0xFF800000> : vector<2x8xf32>
    %1 = vector.multi_reduction <maximumf>, %0, %cst [2] : vector<2x8x4xf32> to vector<2x8xf32>
    %2 = vector.shape_cast %1 : vector<2x8xf32> to vector<2x8x1xf32>
    %3 = vector.broadcast %2 : vector<2x8x1xf32> to vector<2x8x4xf32>
    %4 = arith.subf %0, %3 : vector<2x8x4xf32>
    %5 = math.exp %4 : vector<2x8x4xf32>
    %cst_2 = arith.constant dense<0.000000e+00> : vector<2x8xf32>
    %6 = vector.multi_reduction <add>, %5, %cst_2 [2] : vector<2x8x4xf32> to vector<2x8xf32>
    %7 = vector.shape_cast %6 : vector<2x8xf32> to vector<2x8x1xf32>
    %8 = vector.broadcast %7 : vector<2x8x1xf32> to vector<2x8x4xf32>
    %9 = arith.divf %5, %8 : vector<2x8x4xf32>
    %cst_3 = arith.constant dense<0.000000e+00> : vector<2x4xf32>
    %10 = vector.multi_reduction <add>, %9, %cst_3 [1] : vector<2x8x4xf32> to vector<2x4xf32>
    %11 = vector.shape_cast %10 : vector<2x4xf32> to vector<2x1x4xf32>
    %cst_4 = arith.constant 8.000000e+00 : f32
    %12 = vector.broadcast %cst_4 : f32 to vector<2x1x4xf32>
    %13 = arith.divf %11, %12 : vector<2x1x4xf32>
    %14 = vector.broadcast %13 : vector<2x1x4xf32> to vector<2x8x4xf32>
    %15 = arith.subf %9, %14 : vector<2x8x4xf32>
    %cst_5 = arith.constant -5.000000e+00 : f32
    %16 = vector.broadcast %cst_5 : f32 to vector<2x8x4xf32>
    %17 = arith.mulf %16, %15 : vector<2x8x4xf32>
    %18 = math.exp %17 : vector<2x8x4xf32>
    %19 = vector.shape_cast %18 : vector<2x8x4xf32> to vector<2x8x4x1xf32>
    %c0_6 = arith.constant 0 : index
    %c0_7 = arith.constant 0 : index
    %c0_8 = arith.constant 0 : index
    %20 = vector.load %arg2[%c0_6, %c0_7, %c0_8] : memref<8x4x64xf32, #tpu.memory_space<vmem>>, vector<8x4x64xf32>
    %21 = vector.shape_cast %20 : vector<8x4x64xf32> to vector<1x8x4x64xf32>
    %22 = vector.broadcast %19 : vector<2x8x4x1xf32> to vector<2x8x4x64xf32>
    %23 = vector.broadcast %21 : vector<1x8x4x64xf32> to vector<2x8x4x64xf32>
    %24 = arith.mulf %22, %23 : vector<2x8x4x64xf32>
    %cst_9 = arith.constant dense<0.000000e+00> : vector<2x4x64xf32>
    %25 = vector.multi_reduction <add>, %24, %cst_9 [1] : vector<2x8x4x64xf32> to vector<2x4x64xf32>
    %cst_10 = arith.constant dense<0.000000e+00> : vector<2x64xf32>
    %26 = vector.multi_reduction <add>, %25, %cst_10 [1] : vector<2x4x64xf32> to vector<2x64xf32>
    %c0_11 = arith.constant 0 : index
    %c0_12 = arith.constant 0 : index
    %27 = vector.load %arg3[%c0_11, %c0_12] : memref<1x64xf32, #tpu.memory_space<vmem>>, vector<1x64xf32>
    %28 = vector.broadcast %27 : vector<1x64xf32> to vector<2x64xf32>
    %29 = arith.addf %26, %28 : vector<2x64xf32>
    %30 = vector.shape_cast %29 : vector<2x64xf32> to vector<2x1x64xf32>
    %c0_13 = arith.constant 0 : index
    %c0_14 = arith.constant 0 : index
    %31 = vector.load %arg4[%c0_13, %c0_14] : memref<8x64xf32, #tpu.memory_space<vmem>>, vector<8x64xf32>
    %32 = vector.shape_cast %31 : vector<8x64xf32> to vector<1x8x64xf32>
    %33 = vector.broadcast %30 : vector<2x1x64xf32> to vector<2x8x64xf32>
    %34 = vector.broadcast %32 : vector<1x8x64xf32> to vector<2x8x64xf32>
    %35 = arith.mulf %33, %34 : vector<2x8x64xf32>
    %cst_15 = arith.constant dense<0.000000e+00> : vector<2x8xf32>
    %36 = vector.multi_reduction <add>, %35, %cst_15 [2] : vector<2x8x64xf32> to vector<2x8xf32>
    %37 = arith.subf %36, %36 : vector<2x8xf32>
    %38 = math.exp %37 : vector<2x8xf32>
    %39 = arith.divf %38, %38 : vector<2x8xf32>
    %40 = vector.shape_cast %39 : vector<2x8xf32> to vector<2x8x1xf32>
    %41 = vector.broadcast %40 : vector<2x8x1xf32> to vector<2x8x4xf32>
    %42 = arith.mulf %0, %41 : vector<2x8x4xf32>
    %cst_16 = arith.constant dense<0.000000e+00> : vector<2x4xf32>
    %43 = vector.multi_reduction <add>, %42, %cst_16 [1] : vector<2x8x4xf32> to vector<2x4xf32>
    %c0_17 = arith.constant 0 : index
    %c0_18 = arith.constant 0 : index
    %44 = vector.load %arg5[%c0_17, %c0_18] : memref<2x4xf32, #tpu.memory_space<vmem>>, vector<2x4xf32>
    tpu.vector_store %arg5[%c0_17, %c0_18], %43 {strides = array<i32>} : memref<2x4xf32, #tpu.memory_space<vmem>>, vector<2x4xf32>,
    return
  }
  func.func @transform_0(%arg0: i32) -> (i32, i32, i32) {
    %c0_i32 = arith.constant 0 : i32
    %c0_i32_0 = arith.constant 0 : i32
    %c0_i32_1 = arith.constant 0 : i32
    %c0_i32_2 = arith.constant 0 : i32
    return %c0_i32, %c0_i32_0, %c0_i32_1 : i32, i32, i32
  }
  func.func @transform_1(%arg0: i32) -> (i32, i32, i32) {
    %c0_i32 = arith.constant 0 : i32
    %c0_i32_0 = arith.constant 0 : i32
    %c0_i32_1 = arith.constant 0 : i32
    %c0_i32_2 = arith.constant 0 : i32
    return %c0_i32, %c0_i32_0, %c0_i32_1 : i32, i32, i32
  }
  func.func @transform_2(%arg0: i32) -> (i32, i32) {
    %c0_i32 = arith.constant 0 : i32
    %c0_i32_0 = arith.constant 0 : i32
    %c0_i32_1 = arith.constant 0 : i32
    return %c0_i32, %c0_i32_0 : i32, i32
  }
  func.func @transform_3(%arg0: i32) -> (i32, i32) {
    %c0_i32 = arith.constant 0 : i32
    %c0_i32_0 = arith.constant 0 : i32
    %c0_i32_1 = arith.constant 0 : i32
    return %c0_i32, %c0_i32_0 : i32, i32
  }
  func.func @transform_4(%arg0: i32) -> (i32, i32) {
    %c0_i32 = arith.constant 0 : i32
    %c0_i32_0 = arith.constant 0 : i32
    %c0_i32_1 = arith.constant 0 : i32
    return %c0_i32, %c0_i32_0 : i32, i32
  }
}

</mosaic_0001>

<bundles_post_ra>
// kernel: attention_fuse_forward_batched.1
= control target key start
LH: loop header
LB: loop body
LE: loop exit
PB: predicated region body
PF: predicated region fallthrough
CT: control target
= control target key end

     0   :  { %9 = vsyncpa [#allocation3], 0  ;;  %s558_s0 = inlined_call_operand.vmem [shape: f32[2,8,4], index: 0, kind: input, shape index: {}]   ;;  %s559_s1 = inlined_call_operand.hbm [shape: f32[8,4,64], index: 1, kind: input, shape index: {}]   ;;  %s560_s2 = inlined_call_operand.vmem [shape: f32[1,64], index: 2, kind: input, shape index: {}]   ;;  %s561_s3 = inlined_call_operand.vmem [shape: f32[8,64], index: 3, kind: input, shape index: {}]   ;;  %s562_s4 = inlined_call_operand.hbm [shape: f32[2,4], index: 4, kind: output, shape index: {}]  }
   0x1   :  { %10 = vsyncpa [#allocation4], 0  ;;  %s17_s17 = sshll.u32 %s559_s1, 4  ;;  %s474_s18 = smov [#allocation2]   ;;  %s18_s17 = int_to_ptr.hbm [resolvable:$true] %s17_s17 }
   0x2   :  { %s19_s19 = sshll.u32 %s474_s18, 4  ;;  %s475_s20 = smov 64   ;;  %s20_s19 = int_to_ptr.vmem [resolvable:$true] %s19_s19 }
   0x3   :  { %s476_s21 = smov 4  }
   0x4   :  { %25 = dma.hbm_to_vmem [thread:$0]  %s18_s17, 512, %s20_s19, [#allocation3], %s475_s20, %s475_s20, %s476_s21  }
   0x5   :  { %470 = dma.done.wait [#allocation3], 512  }
   0x6   :  { %471 = vsyncadd [#allocation3], 4294966784  ;;  %vm36_vm0 = vcmask 31744   ;;  %v510_v0 = vld [vmem:[%s558_s0] sm:$0xff]  ;;  %v517_v2 = vld [vmem:[%s558_s0 + $0x8] sm:$0xff]  ;;  %v477_v15 = vmov 8.0   ;;  %v117_v16 = vlaneseq }
   0x7   :  { %v37_v1 = vsel %vm36_vm0, %v510_v0, -inf  ;;  %v40_v3 = vsel %vm36_vm0, %v517_v2, -inf  ;;  %vm252_vm10 = vcmask 519168   ;;  %vm308_vm11 = vcmask 523264   ;;  %s381_s30 = sshll.u32 %s562_s4, 4  ;;  %s382_s30 = int_to_ptr.hbm [resolvable:$true] %s381_s30 }
   0x8   :  { %38 = vmax.xlane.f32.xlu0 %v37_v1  ;;  %v118_v20 = vshrl.u32 %v117_v16, 7 }
   0xa   :  { %396 = vset.pattern.permute.xlu2 %v118_v20  ;;  %398 = vset.pattern.permute.xlu1 %v118_v20 }
   0xb   :  { %397 = vset.pattern.permute.xlu0 %v118_v20 }
  0x10   :  { %41 = vmax.xlane.f32.xlu0 %v40_v3 }
  0x7b   :  { %v39_v4 = vpop.xlane.xlu0 %38 }
  0x7c   :  { %v43_v5 = vsub.f32 %v510_v0, %v39_v4 }
  0x7e   :  { %v45_v6 = vmul.f32 1.442695, %v43_v5 }
  0x80   :  { %400 = vpow2.f32 %v45_v6 }
  0x83   :  { %v42_v7 = vpop.xlane.xlu0 %41 }
  0x84   :  { %v44_v8 = vsub.f32 %v517_v2, %v42_v7 }
  0x86   :  { %v401_v9 = vpop.eup %400  ;;  %v47_v10 = vmul.f32 1.442695, %v44_v8 }
  0x87   :  { %v49_v11 = vsel %vm36_vm0, %v401_v9, 0.0 }
  0x88   :  { %402 = vpow2.f32 %v47_v10  ;;  %50 = vadd.xlane.f32.xlu1 %v49_v11 }
  0x8e   :  { %v403_v12 = vpop.eup %402 }
  0x8f   :  { %v52_v13 = vsel %vm36_vm0, %v403_v12, 0.0 }
  0x90   :  { %53 = vadd.xlane.f32.xlu1 %v52_v13 }
  0xfb   :  { %v51_v14 = vpop.xlane.xlu1 %50 }
  0xfc   :  { %404 = vrcp.f32 %v51_v14  ;;  %v66_v23 = vand.u32 2147483648, %v51_v14  ;;  %v64_v25 = vand.u32 2147483647, %v51_v14  ;;  %vm60_vm2 = vweird.f32 %v51_v14 }
  0xfd   :  { %406 = vrcp.f32 %v477_v15 }
  0xfe   :  { %v67_v29 = vor.u32 1.1754944e-38, %v66_v23  ;;  %vm65_vm4 = vcmp.eq.f32.partialorder %v64_v25, 8.507059e+37 }
 0x102   :  { %v405_v17 = vpop.eup %404 }
 0x103   :  { %v56_v18 = vmul.f32 %v405_v17, %v51_v14  ;;  %v54_v19 = vpop.xlane.xlu1 %53  ;;  %v407_v22 = vpop.eup %406  ;;  %vm61_vm1 = vweird.f32 %v405_v17 }
 0x104   :  { %408 = vrcp.f32 %v54_v19  ;;  %v100_v26 = vmul.f32 8.0, %v407_v22  ;;  %vm62_vm3 = vmor %vm60_vm2, %vm61_vm1  ;;  %vm75_vm5 = vweird.f32 %v54_v19  ;;  %v81_v36 = vand.u32 2147483648, %v54_v19 }
 0x105   :  { %v57_v21 = vsub.f32 1.0, %v56_v18  ;;  %v79_v39 = vand.u32 2147483647, %v54_v19  ;;  %vm104_vm9 = vweird.f32 %v407_v22 }
 0x106   :  { %v101_v33 = vsub.f32 1.0, %v100_v26  ;;  %v82_v44 = vor.u32 1.1754944e-38, %v81_v36  ;;  %v230_v36 = vld [vmem:[#allocation2 + $0x8] sm:$0xf] }
 0x107   :  { %v58_v24 = vmul.f32 %v405_v17, %v57_v21  ;;  %vm80_vm8 = vcmp.eq.f32.partialorder %v79_v39, 8.507059e+37  ;;  %v231_v39 = vld [vmem:[#allocation2 + $0xc] sm:$0xf] }
 0x108   :  { %v102_v41 = vmul.f32 %v407_v22, %v101_v33 }
 0x109   :  { %v59_v27 = vadd.f32 %v405_v17, %v58_v24 }
 0x10a   :  { %v409_v28 = vpop.eup %408  ;;  %v103_v48 = vadd.f32 %v407_v22, %v102_v41 }
 0x10b   :  { %v63_v30 = vsel %vm62_vm3, %v405_v17, %v59_v27  ;;  %v71_v31 = vmul.f32 %v409_v28, %v54_v19  ;;  %vm76_vm6 = vweird.f32 %v409_v28 }
 0x10c   :  { %v68_v32 = vsel %vm65_vm4, %v67_v29, %v63_v30  ;;  %vm77_vm7 = vmor %vm75_vm5, %vm76_vm6  ;;  %v105_v54 = vsel %vm104_vm9, %v407_v22, %v103_v48  ;;  %vm369_vm5 = vcmask 1041409   ;;  %vm372_vm6 = vcmask 25600  }
 0x10d   :  { %v69_v34 = vmul.f32 %v401_v9, %v68_v32  ;;  %v72_v35 = vsub.f32 1.0, %v71_v31  ;;  %v229_v32 = vld [vmem:[#allocation2 + $0x4] sm:$0xf] }
 0x10f   :  { %v85_v37 = vsel %vm36_vm0, %v69_v34, 0.0  ;;  %v73_v38 = vmul.f32 %v409_v28, %v72_v35  ;;  %v228_v35 = vld [vmem:[#allocation2] sm:$0xf] }
 0x110   :  { %v86_v40 = vrot.slane %v85_v37, 4 }
 0x111   :  { %v74_v42 = vadd.f32 %v409_v28, %v73_v38 }
 0x112   :  { %v87_v43 = vadd.f32 %v86_v40, %v85_v37 }
 0x113   :  { %v78_v45 = vsel %vm77_vm7, %v409_v28, %v74_v42 }
 0x114   :  { %v88_v46 = vrot.slane %v87_v43, 2  ;;  %v83_v47 = vsel %vm80_vm8, %v82_v44, %v78_v45  ;;  %v232_v44 = vld [vmem:[#allocation2 + $0x10] sm:$0xf] }
 0x115   :  { %v84_v49 = vmul.f32 %v403_v12, %v83_v47 }
 0x116   :  { %v89_v50 = vadd.f32 %v88_v46, %v87_v43 }
 0x117   :  { %v92_v51 = vsel %vm36_vm0, %v84_v49, 0.0 }
 0x118   :  { %v90_v52 = vrot.slane %v89_v50, 1  ;;  %v93_v53 = vrot.slane %v92_v51, 4 }
 0x11a   :  { %v91_v55 = vadd.f32 %v90_v52, %v89_v50  ;;  %v94_v56 = vadd.f32 %v93_v53, %v92_v51 }
 0x11c   :  { %v106_v57 = vmul.f32 %v105_v54, %v91_v55  ;;  %v95_v58 = vrot.slane %v94_v56, 2  ;;  %v233_v55 = vld [vmem:[#allocation2 + $0x14] sm:$0xf] }
 0x11e   :  { %v108_v59 = vsub.f32 %v69_v34, %v106_v57  ;;  %v96_v60 = vadd.f32 %v95_v58, %v94_v56 }
 0x120   :  { %v110_v61 = vmul.f32 -5.0, %v108_v59  ;;  %v97_v62 = vrot.slane %v96_v60, 1 }
 0x122   :  { %v112_v63 = vmul.f32 1.442695, %v110_v61  ;;  %v98_v1 = vadd.f32 %v97_v62, %v96_v60 }
 0x124   :  { %410 = vpow2.f32 %v112_v63  ;;  %v107_v3 = vmul.f32 %v105_v54, %v98_v1 }
 0x126   :  { %v109_v4 = vsub.f32 %v84_v49, %v107_v3  ;;  %v235_v3 = vld [vmem:[#allocation2 + $0x1c] sm:$0xf] }
 0x128   :  { %v111_v5 = vmul.f32 -5.0, %v109_v4 }
 0x12a   :  { %v411_v6 = vpop.eup %410  ;;  %v114_v7 = vmul.f32 1.442695, %v111_v5  ;;  %v234_v5 = vld [vmem:[#allocation2 + $0x18] sm:$0xf] }
 0x12b   :  { %v116_v8 = vperm.slane %v411_v6, 0  ;;  %v123_v10 = vperm.slane %v411_v6, 1  ;;  %v130_v13 = vperm.slane %v411_v6, 2  ;;  %v144_v14 = vperm.slane %v411_v6, 4 }
 0x12c   :  { %412 = vpow2.f32 %v114_v7  ;;  %v151_v17 = vperm.slane %v411_v6, 5  ;;  %v165_v18 = vperm.slane %v411_v6, 7  ;;  %v137_v19 = vperm.slane %v411_v6, 3 }
 0x12d   :  { %121 = vperm.xlu2 %396, %v116_v8   ;;  %v158_v23 = vperm.slane %v411_v6, 6 }
 0x132   :  { %v413_v9 = vpop.eup %412 }
 0x133   :  { %v179_v11 = vperm.slane %v413_v9, 1  ;;  %v172_v12 = vperm.slane %v413_v9, 0  ;;  %v207_v15 = vperm.slane %v413_v9, 5  ;;  %v186_v16 = vperm.slane %v413_v9, 2 }
 0x134   :  { %v214_v20 = vperm.slane %v413_v9, 6  ;;  %v193_v21 = vperm.slane %v413_v9, 3  ;;  %v200_v22 = vperm.slane %v413_v9, 4  ;;  %v221_v24 = vperm.slane %v413_v9, 7 }
 0x135   :  { %128 = vperm.xlu2 %396, %v123_v10   ;;  %184 = vperm.xlu1 %398, %v179_v11  }
 0x136   :  { %177 = vperm.xlu0 %397, %v172_v12  }
 0x13d   :  { %135 = vperm.xlu2 %396, %v130_v13   ;;  %149 = vperm.xlu1 %398, %v144_v14  }
 0x13e   :  { %212 = vperm.xlu0 %397, %v207_v15  }
 0x145   :  { %191 = vperm.xlu2 %396, %v186_v16   ;;  %156 = vperm.xlu1 %398, %v151_v17  }
 0x146   :  { %170 = vperm.xlu0 %397, %v165_v18  }
 0x14d   :  { %142 = vperm.xlu2 %396, %v137_v19   ;;  %219 = vperm.xlu1 %398, %v214_v20  }
 0x155   :  { %198 = vperm.xlu2 %396, %v193_v21  }
 0x15d   :  { %205 = vperm.xlu2 %396, %v200_v22  }
 0x165   :  { %163 = vperm.xlu2 %396, %v158_v23  }
 0x16d   :  { %226 = vperm.xlu2 %396, %v221_v24  }
 0x187   :  { %v122_v25 = vpop.permute.xlu2 %121 }
 0x188   :  { %v236_v38 = vmul.f32 %v228_v35, %v122_v25 }
 0x18a   :  { %v253_v47 = vsel %vm252_vm10, %v236_v38, 0.0 }
 0x18f   :  { %v129_v26 = vpop.permute.xlu2 %128 }
 0x190   :  { %v237_v37 = vmul.f32 %v229_v32, %v129_v26 }
 0x192   :  { %v254_v45 = vsel %vm252_vm10, %v237_v37, 0.0 }
 0x193   :  { %v255_v54 = vadd.f32 %v254_v45, %v253_v47  ;;  %v303_v47 = vld [vmem:[%s561_s3] sm:$0xff] }
 0x197   :  { %v136_v27 = vpop.permute.xlu2 %135 }
 0x198   :  { %v238_v41 = vmul.f32 %v230_v36, %v136_v27 }
 0x19a   :  { %v256_v50 = vsel %vm252_vm10, %v238_v41, 0.0 }
 0x19b   :  { %v257_v60 = vadd.f32 %v256_v50, %v255_v54 }
 0x19f   :  { %v192_v28 = vpop.permute.xlu2 %191 }
 0x1a0   :  { %v246_v56 = vmul.f32 %v230_v36, %v192_v28 }
 0x1a2   :  { %v271_v6 = vsel %vm252_vm10, %v246_v56, 0.0 }
 0x1a7   :  { %v143_v29 = vpop.permute.xlu2 %142  ;;  %v185_v30 = vpop.permute.xlu1 %184 }
 0x1a8   :  { %v178_v31 = vpop.permute.xlu0 %177  ;;  %v245_v42 = vmul.f32 %v229_v32, %v185_v30  ;;  %v239_v46 = vmul.f32 %v231_v39, %v143_v29 }
 0x1a9   :  { %v244_v43 = vmul.f32 %v228_v35, %v178_v31 }
 0x1aa   :  { %v269_v51 = vsel %vm252_vm10, %v245_v42, 0.0  ;;  %v258_v57 = vsel %vm252_vm10, %v239_v46, 0.0  ;;  %v399_v42 = vld [vmem:[%s560_s2] ss:$0 sm:$0xff]  ;;  %s478_s2 = smov [#allocation5]  }
 0x1ab   :  { %v268_v52 = vsel %vm252_vm10, %v244_v43, 0.0  ;;  %v259_v1 = vadd.f32 %v258_v57, %v257_v60  ;;  %s379_s3 = sshll.u32 %s478_s2, 4  ;;  %s380_s3 = int_to_ptr.vmem [resolvable:$true] %s379_s3 }
 0x1ac   :  { %v270_v61 = vadd.f32 %v269_v51, %v268_v52 }
 0x1ae   :  { %v272_v9 = vadd.f32 %v271_v6, %v270_v61 }
 0x1af   :  { %v199_v33 = vpop.permute.xlu2 %198  ;;  %v150_v34 = vpop.permute.xlu1 %149 }
 0x1b0   :  { %v213_v40 = vpop.permute.xlu0 %212  ;;  %v240_v53 = vmul.f32 %v232_v44, %v150_v34  ;;  %v247_v58 = vmul.f32 %v231_v39, %v199_v33 }
 0x1b1   :  { %v249_v18 = vmul.f32 %v233_v55, %v213_v40 }
 0x1b2   :  { %v260_v62 = vsel %vm252_vm10, %v240_v53, 0.0  ;;  %v273_v7 = vsel %vm252_vm10, %v247_v58, 0.0 }
 0x1b3   :  { %v261_v10 = vadd.f32 %v260_v62, %v259_v1  ;;  %v274_v16 = vadd.f32 %v273_v7, %v272_v9  ;;  %v277_v25 = vsel %vm252_vm10, %v249_v18, 0.0 }
 0x1b7   :  { %v206_v48 = vpop.permute.xlu2 %205  ;;  %v157_v49 = vpop.permute.xlu1 %156 }
 0x1b8   :  { %v241_v59 = vmul.f32 %v233_v55, %v157_v49  ;;  %v248_v63 = vmul.f32 %v232_v44, %v206_v48  ;;  %v171_v4 = vpop.permute.xlu0 %170 }
 0x1b9   :  { %v243_v14 = vmul.f32 %v235_v3, %v171_v4 }
 0x1ba   :  { %v262_v8 = vsel %vm252_vm10, %v241_v59, 0.0  ;;  %v275_v13 = vsel %vm252_vm10, %v248_v63, 0.0 }
 0x1bb   :  { %v263_v17 = vadd.f32 %v262_v8, %v261_v10  ;;  %v276_v21 = vadd.f32 %v275_v13, %v274_v16  ;;  %v266_v23 = vsel %vm252_vm10, %v243_v14, 0.0 }
 0x1bd   :  { %v278_v28 = vadd.f32 %v277_v25, %v276_v21 }
 0x1bf   :  { %v164_v11 = vpop.permute.xlu2 %163  ;;  %v220_v12 = vpop.permute.xlu1 %219 }
 0x1c0   :  { %v242_v15 = vmul.f32 %v234_v5, %v164_v11  ;;  %v250_v20 = vmul.f32 %v234_v5, %v220_v12 }
 0x1c2   :  { %v264_v19 = vsel %vm252_vm10, %v242_v15, 0.0  ;;  %v279_v26 = vsel %vm252_vm10, %v250_v20, 0.0 }
 0x1c3   :  { %v265_v22 = vadd.f32 %v264_v19, %v263_v17  ;;  %v280_v32 = vadd.f32 %v279_v26, %v278_v28 }
 0x1c5   :  { %v267_v24 = vadd.f32 %v266_v23, %v265_v22 }
 0x1c7   :  { %v283_v27 = vsel %vm252_vm10, %v267_v24, 0.0  ;;  %v227_v29 = vpop.permute.xlu2 %226 }
 0x1c8   :  { %v284_v30 = vrot.slane %v283_v27, 4  ;;  %v251_v31 = vmul.f32 %v235_v3, %v227_v29 }
 0x1ca   :  { %v285_v33 = vadd.f32 %v284_v30, %v283_v27  ;;  %v281_v34 = vsel %vm252_vm10, %v251_v31, 0.0 }
 0x1cb   :  { %v282_v35 = vadd.f32 %v281_v34, %v280_v32 }
 0x1cc   :  { %v286_v36 = vrot.slane %v285_v33, 2 }
 0x1cd   :  { %v290_v37 = vsel %vm252_vm10, %v282_v35, 0.0 }
 0x1ce   :  { %v291_v38 = vrot.slane %v290_v37, 4  ;;  %v287_v39 = vadd.f32 %v286_v36, %v285_v33 }
 0x1d0   :  { %v292_v40 = vadd.f32 %v291_v38, %v290_v37  ;;  %v288_v41 = vrot.slane %v287_v39, 1 }
 0x1d2   :  { %v293_v43 = vrot.slane %v292_v40, 2  ;;  %v289_v44 = vadd.f32 %v288_v41, %v287_v39 }
 0x1d4   :  { %v294_v45 = vadd.f32 %v293_v43, %v292_v40  ;;  %v301_v46 = vadd.f32 %v399_v42, %v289_v44 }
 0x1d6   :  { %v304_v48 = vperm.slane %v301_v46, 0  ;;  %v295_v49 = vrot.slane %v294_v45, 1 }
 0x1d8   :  { %v306_v50 = vmul.f32 %v304_v48, %v303_v47  ;;  %v296_v51 = vadd.f32 %v295_v49, %v294_v45 }
 0x1da   :  { %v309_v52 = vsel %vm308_vm11, %v306_v50, 0.0  ;;  %v302_v53 = vadd.f32 %v399_v42, %v296_v51 }
 0x1db   :  { %310 = vadd.xlane.f32.xlu1 %v309_v52 }
 0x1dc   :  { %v305_v54 = vperm.slane %v302_v53, 0 }
 0x1de   :  { %v307_v55 = vmul.f32 %v305_v54, %v303_v47 }
 0x1e0   :  { %v312_v56 = vsel %vm308_vm11, %v307_v55, 0.0 }
 0x1e1   :  { %313 = vadd.xlane.f32.xlu0 %v312_v56 }
 0x24e   :  { %v311_v57 = vpop.xlane.xlu1 %310 }
 0x24f   :  { %v315_v58 = vsub.f32 %v311_v57, %v311_v57 }
 0x251   :  { %v317_v59 = vmul.f32 1.442695, %v315_v58 }
 0x253   :  { %414 = vpow2.f32 %v317_v59 }
 0x254   :  { %v314_v60 = vpop.xlane.xlu0 %313 }
 0x255   :  { %v316_v61 = vsub.f32 %v314_v60, %v314_v60 }
 0x257   :  { %v319_v62 = vmul.f32 1.442695, %v316_v61 }
 0x259   :  { %v415_v63 = vpop.eup %414  ;;  %416 = vpow2.f32 %v319_v62 }
 0x25a   :  { %418 = vrcp.f32 %v415_v63  ;;  %v332_v6 = vand.u32 2147483648, %v415_v63  ;;  %v330_v8 = vand.u32 2147483647, %v415_v63  ;;  %vm326_vm13 = vweird.f32 %v415_v63 }
 0x25c   :  { %v333_v12 = vor.u32 1.1754944e-38, %v332_v6  ;;  %vm331_vm15 = vcmp.eq.f32.partialorder %v330_v8, 8.507059e+37 }
 0x25f   :  { %v417_v1 = vpop.eup %416 }
 0x260   :  { %v419_v3 = vpop.eup %418  ;;  %420 = vrcp.f32 %v417_v1  ;;  %v347_v16 = vand.u32 2147483648, %v417_v1  ;;  %v345_v19 = vand.u32 2147483647, %v417_v1  ;;  %vm341_vm2 = vweird.f32 %v417_v1 }
 0x261   :  { %v322_v4 = vmul.f32 %v419_v3, %v415_v63  ;;  %vm327_vm12 = vweird.f32 %v419_v3 }
 0x262   :  { %vm328_vm14 = vmor %vm326_vm13, %vm327_vm12  ;;  %v348_v22 = vor.u32 1.1754944e-38, %v347_v16  ;;  %vm346_vm4 = vcmp.eq.f32.partialorder %v345_v19, 8.507059e+37 }
 0x263   :  { %v323_v5 = vsub.f32 1.0, %v322_v4 }
 0x265   :  { %v324_v7 = vmul.f32 %v419_v3, %v323_v5 }
 0x266   :  { %v421_v9 = vpop.eup %420 }
 0x267   :  { %v325_v10 = vadd.f32 %v419_v3, %v324_v7  ;;  %v337_v11 = vmul.f32 %v421_v9, %v417_v1  ;;  %vm342_vm1 = vweird.f32 %v421_v9 }
 0x268   :  { %vm343_vm3 = vmor %vm341_vm2, %vm342_vm1 }
 0x269   :  { %v329_v13 = vsel %vm328_vm14, %v419_v3, %v325_v10  ;;  %v338_v14 = vsub.f32 1.0, %v337_v11 }
 0x26a   :  { %v334_v15 = vsel %vm331_vm15, %v333_v12, %v329_v13 }
 0x26b   :  { %v335_v17 = vmul.f32 %v415_v63, %v334_v15  ;;  %v339_v18 = vmul.f32 %v421_v9, %v338_v14 }
 0x26d   :  { %v340_v20 = vadd.f32 %v421_v9, %v339_v18  ;;  %v351_v21 = vmul.f32 %v335_v17, %v510_v0 }
 0x26f   :  { %v344_v23 = vsel %vm343_vm3, %v421_v9, %v340_v20  ;;  %v353_v24 = vsel %vm36_vm0, %v351_v21, 0.0 }
 0x270   :  { %v349_v25 = vsel %vm346_vm4, %v348_v22, %v344_v23  ;;  %v354_v26 = vrot.slane %v353_v24, 4 }
 0x271   :  { %v350_v27 = vmul.f32 %v417_v1, %v349_v25 }
 0x272   :  { %v355_v28 = vadd.f32 %v354_v26, %v353_v24 }
 0x273   :  { %v352_v29 = vmul.f32 %v350_v27, %v517_v2 }
 0x274   :  { %v356_v30 = vrot.slane %v355_v28, 2 }
 0x275   :  { %v360_v31 = vsel %vm36_vm0, %v352_v29, 0.0 }
 0x276   :  { %v361_v32 = vrot.slane %v360_v31, 4  ;;  %v357_v33 = vadd.f32 %v356_v30, %v355_v28 }
 0x278   :  { %v362_v34 = vadd.f32 %v361_v32, %v360_v31  ;;  %v358_v0 = vrot.slane %v357_v33, 1 }
 0x27a   :  { %v363_v35 = vrot.slane %v362_v34, 2  ;;  %v359_v38 = vadd.f32 %v358_v0, %v357_v33 }
 0x27c   :  { %v364_v36 = vadd.f32 %v363_v35, %v362_v34 }
 0x27e   :  { %v365_v37 = vrot.slane %v364_v36, 1 }
 0x280   :  { %v366_v39 = vadd.f32 %v365_v37, %v364_v36 }
 0x282   :  { %v370_v2 = vsel %vm369_vm5, %v366_v39, %v359_v38 }
 0x283   :  { %373 = vst.msk [vmem:[#allocation5] sm:$0x3] %vm372_vm6, %v370_v2 }
 0x284   :  { %384 = dma.vmem_to_hbm [thread:$0]  %s380_s3, 32, %s382_s30, [#allocation4]  }
 0x285   :  { %472 = dma.done.wait [#allocation4], 32  }
 0x286   :  { %473 = vsyncadd [#allocation4], 4294967264 }
 0x287   :  { %389 = vsyncpa [#allocation3], 1 }
 0x288   :  { %390 = vsyncpa [#allocation4], 1 }

</bundles_post_ra>
